<compile_context>
chip_gen: v7x
topology: tpu7x:2x2x1
jax: 0.10.0
libtpu: 0.0.40
codegen_flags: <defaults>
</compile_context>

<pallas_src>
import jax
import jax.numpy as jnp
from jax.experimental import pallas as pl
from jax.experimental.pallas import tpu as pltpu


def _dma_flatten_copy_kernel(x_hbm_ref, o_hbm_ref, sem):
    # Whole-array HBM -> HBM DMA; no VMEM staging, no per-tile grid steps.
    cp = pltpu.make_async_copy(x_hbm_ref, o_hbm_ref, sem)
    cp.start()
    cp.wait()


def flatten(x: jax.Array) -> jax.Array:
    """Flatten each sample of a batch: (B, *dims) -> (B, prod(dims))."""
    B = x.shape[0]
    flat = 1
    for d in x.shape[1:]:
        flat *= d

    # Free wrapper-side reshape (row-major == torch .view(B, -1) on a
    # contiguous tensor). The kernel only performs a single bulk copy.
    x2d = jnp.reshape(x, (B, flat))

    nbytes = x.dtype.itemsize * B * flat

    return pl.pallas_call(
        _dma_flatten_copy_kernel,
        out_shape=jax.ShapeDtypeStruct((B, flat), x.dtype),
        in_specs=[pl.BlockSpec(memory_space=pl.ANY)],
        out_specs=pl.BlockSpec(memory_space=pl.ANY),
        scratch_shapes=[pltpu.SemaphoreType.DMA],
        compiler_params=pltpu.CompilerParams(has_side_effects=True),
        cost_estimate=pl.CostEstimate(
            flops=0, transcendentals=0, bytes_accessed=2 * nbytes
        ),
    )(x2d)


if __name__ == "__main__":
    key = jax.random.PRNGKey(0)
    B, C, H, W = 2, 4, 16, 16
    x = jax.random.normal(key, (B, C, H, W), dtype=jnp.float32)

    y = flatten(x)
    jax.block_until_ready(y)

    # Reference: plain row-major reshape (== torch .view(B, -1) on contiguous NCHW).
    y_ref = jnp.reshape(x, (B, C * H * W))
    assert y.shape == (B, C * H * W), y.shape
    assert y.dtype == x.dtype
    assert jnp.array_equal(y, y_ref), "mismatch vs reference reshape"

    print("KERNEL_OK")
</pallas_src>

<mosaic_0001>
module attributes {stable_mosaic.version = 11 : i64} {
  func.func @_dma_flatten_copy_kernel(%arg0: memref<2x1024xf32, #tpu.memory_space<any>>, %arg1: memref<2x1024xf32, #tpu.memory_space<any>>, %arg2: memref<!tpu.dma_semaphore, #tpu.memory_space<semaphore_mem>>) attributes {dimension_semantics = [], scalar_prefetch = 0 : i64, scratch_operands = 1 : i64, tpu.core_type = #tpu.core_type<tc>} {
    tpu.enqueue_dma source(%arg0 : memref<2x1024xf32, #tpu.memory_space<any>>) target(%arg1 : memref<2x1024xf32, #tpu.memory_space<any>>) target_semaphore(%arg2 : memref<!tpu.dma_semaphore, #tpu.memory_space<semaphore_mem>>)
    tpu.wait_dma2 semaphore(%arg2 : memref<!tpu.dma_semaphore, #tpu.memory_space<semaphore_mem>>) src(%arg0 : memref<2x1024xf32, #tpu.memory_space<any>>) dst(%arg1 : memref<2x1024xf32, #tpu.memory_space<any>>)
    return
  }
}

</mosaic_0001>

<bundles_post_ra>
// kernel: tpu_custom_call.1
= control target key start
LH: loop header
LB: loop body
LE: loop exit
PB: predicated region body
PF: predicated region fallthrough
CT: control target
= control target key end

     0   :  { %s35_s6 = smov [#allocation2]   ;;  %s36_s7 = smov [#allocation3]   ;;  %s54_s0 = inlined_call_operand.hbm [shape: f32[2,1024], index: 0, kind: input, shape index: {}]   ;;  %s55_s1 = inlined_call_operand.hbm [shape: f32[2,1024], index: 1, kind: output, shape index: {}]  }
   0x1   :  { %s37_s8 = smov 0  }
   0x2   :  { %18 = dma.general %s54_s0, 256, %s55_s1, %s35_s6, %s36_s7, [#allocation4], %s37_s8, 0  }
   0x3   :  { %33 = dma.done.wait [#allocation2], 256 }
   0x4   :  { %34 = vsyncadd [#allocation2], 4294967040 }
   0x5   :  { %23 = vsyncmov [#allocation2] }
   0x8   :  { %s24_s13 = vpop.sfrf %23 }
   0x9   :  { %p29_p0 = scmp.ne.s32.totalorder %s24_s13, 0 }
   0xb   :  { %28 = shalt.err (%p29_p0)  }

</bundles_post_ra>
